<compile_context>
chip_gen: v7x
topology: tpu7x:2x2x1
jax: 0.10.0
libtpu: 0.0.40
codegen_flags: <defaults>
</compile_context>

<pallas_src>
import functools

import jax
import jax.numpy as jnp
from jax.experimental import pallas as pl
from jax.experimental.pallas import tpu as pltpu

LN_EPS = 1e-5  # nn.LayerNorm default eps


def _round_up(x, m):
    return (x + m - 1) // m * m


def prenorm_kernel(x_ref, w_ref, b_ref, o_ref):
    # x_ref: (tile_rows, D)  activation tile
    # w_ref: (D, D)          folded weight  w' = gamma[:,None] * w
    # b_ref: (1, D)          folded bias    b' = beta @ w + b   (f32)
    x = x_ref[...].astype(jnp.float32)

    # LayerNorm statistics (two-pass / centered variance, like torch).
    mean = jnp.mean(x, axis=-1, keepdims=True)
    xc = x - mean
    var = jnp.mean(xc * xc, axis=-1, keepdims=True)
    xhat = xc * jax.lax.rsqrt(var + LN_EPS)

    # fn: Linear(D -> D) on the MXU.  Operand dtype = w_ref dtype (bf16 by
    # default, chosen in the wrapper); accumulate in f32.
    y = jnp.dot(xhat.astype(w_ref.dtype), w_ref[...],
                preferred_element_type=jnp.float32)
    o_ref[...] = (y + b_ref[...]).astype(o_ref.dtype)


@functools.partial(jax.jit, static_argnames=("tile_rows", "mxu_bf16"))
def prenorm(x, gamma, beta, w, b, *, tile_rows=1024, mxu_bf16=True):
    """x: (B, N, D) -> (B, N, D).  Fused LayerNorm(D) + Linear(D, D)."""
    B, N, D = x.shape
    rows = B * N
    x2 = x.reshape(rows, D)

    # Fold the LayerNorm affine into the linear (exact):
    #   (xhat*gamma + beta) @ w + b == xhat @ (gamma[:,None]*w) + (beta@w + b)
    gamma_f = gamma.reshape(D).astype(jnp.float32)
    beta_f = beta.reshape(1, D).astype(jnp.float32)
    w_f = w.astype(jnp.float32)
    mm_dtype = jnp.bfloat16 if mxu_bf16 else x.dtype
    w_folded = (gamma_f[:, None] * w_f).astype(mm_dtype)
    b_folded = beta_f @ w_f + b.reshape(1, D).astype(jnp.float32)  # stays f32

    # Row tile: multiple of 8 (sublane); keep >= 2 grid steps when rows allow
    # (v7x dual-TC + pipelining); shrink against a VMEM budget safe for v7x's
    # 64 MiB physical VMEM (and well within v5e/v6e's 128 MiB).
    tile_rows = max(8, min(_round_up(tile_rows, 8),
                           _round_up(pl.cdiv(rows, 2), 8)))
    x_isz = jnp.dtype(x.dtype).itemsize
    w_isz = jnp.dtype(mm_dtype).itemsize

    def vmem_bytes(t):
        blk = t * D
        return (4 * blk * x_isz        # x + out blocks, double-buffered
                + 3 * blk * 4          # f32 temporaries (x, xhat, y)
                + D * D * w_isz        # folded weight, single-buffered
                + 2 * D * 4)           # folded bias

    VMEM_BUDGET = 40 << 20
    while tile_rows > 8 and vmem_bytes(tile_rows) > VMEM_BUDGET:
        tile_rows = max(8, _round_up(tile_rows // 2, 8))

    grid = (pl.cdiv(rows, tile_rows),)  # ragged last block handled by Pallas
    vmem_limit = min(max(vmem_bytes(tile_rows) + (2 << 20), 32 << 20), 60 << 20)

    const = dict(pipeline_mode=pl.Buffered(1))  # grid-invariant operands

    cost = pl.CostEstimate(
        flops=2 * rows * D * D + 8 * rows * D,
        transcendentals=rows,
        bytes_accessed=(2 * rows * D * x_isz + D * D * w_isz + 2 * D * 4),
    )

    out2 = pl.pallas_call(
        prenorm_kernel,
        out_shape=jax.ShapeDtypeStruct((rows, D), x.dtype),
        grid_spec=pltpu.PrefetchScalarGridSpec(
            num_scalar_prefetch=0,
            grid=grid,
            in_specs=[
                pl.BlockSpec((tile_rows, D), lambda i: (i, 0)),    # x tile
                pl.BlockSpec((D, D), lambda i: (0, 0), **const),   # w'
                pl.BlockSpec((1, D), lambda i: (0, 0), **const),   # b'
            ],
            out_specs=pl.BlockSpec((tile_rows, D), lambda i: (i, 0)),
        ),
        compiler_params=pltpu.CompilerParams(
            dimension_semantics=("parallel",),
            vmem_limit_bytes=vmem_limit),
        cost_estimate=cost,
    )(x2, w_folded, b_folded)

    return out2.reshape(B, N, D)


# TODO(synk): PreNorm's `fn` is a generic callable in PyTorch; only the
# Linear(D, D) instantiation is fused here.  Attention/FeedForward bodies
# would need their own fused kernels (and an extra grid axis tiling the
# weight's output columns for very large D).


def prenorm_ref(x, gamma, beta, w, b):
    xf = x.astype(jnp.float32)
    mean = jnp.mean(xf, axis=-1, keepdims=True)
    var = jnp.mean((xf - mean) ** 2, axis=-1, keepdims=True)
    normed = (xf - mean) * jax.lax.rsqrt(var + LN_EPS) * gamma + beta
    return (normed @ w + b).astype(x.dtype)


if __name__ == "__main__":
    # Small, lane-dense test shape.  N=9 makes rows=18 non-divisible by the
    # tile, exercising the ragged last-block path (no host pad/slice).
    B, N, D = 2, 9, 128
    key = jax.random.PRNGKey(0)
    kx, kw, kb, kg, kbe = jax.random.split(key, 5)

    x = jax.random.normal(kx, (B, N, D), dtype=jnp.float32)

    # LayerNorm affine params (non-trivial values to exercise the folding).
    gamma = 1.0 + 0.1 * jax.random.normal(kg, (D,), dtype=jnp.float32)
    beta = 0.1 * jax.random.normal(kbe, (D,), dtype=jnp.float32)

    # fn = Linear(D, D): y = x @ w + b.
    w = jax.random.normal(kw, (D, D), dtype=jnp.float32) * (1.0 / D ** 0.5)
    b = 0.02 * jax.random.normal(kb, (D,), dtype=jnp.float32)

    ref = prenorm_ref(x, gamma, beta, w, b)

    # Default path: MXU fed bf16 operands with f32 accumulation.
    out = prenorm(x, gamma, beta, w, b)
    jax.block_until_ready(out)
    assert out.shape == (B, N, D)
    err_bf16 = float(jnp.max(jnp.abs(out - ref)))
    assert jnp.allclose(out, ref, atol=2e-2, rtol=2e-2), err_bf16

    # Exact f32 MXU path: tight tolerance.
    out32 = prenorm(x, gamma, beta, w, b, mxu_bf16=False)
    jax.block_until_ready(out32)
    err_f32 = float(jnp.max(jnp.abs(out32 - ref)))
    assert jnp.allclose(out32, ref, atol=1e-3, rtol=1e-3), err_f32

    print("KERNEL_OK")
</pallas_src>

<mosaic_0001>
module attributes {stable_mosaic.version = 11 : i64} {
  func.func @prenorm_kernel(%arg0: i32, %arg1: memref<16x128xf32, #tpu.memory_space<vmem>>, %arg2: memref<128x128xbf16, #tpu.memory_space<vmem>>, %arg3: memref<1x128xf32, #tpu.memory_space<vmem>>, %arg4: memref<16x128xf32, #tpu.memory_space<vmem>>) attributes {dimension_semantics = [#tpu.dimension_semantics<parallel>], iteration_bounds = array<i64: 2>, scalar_prefetch = 0 : i64, scratch_operands = 0 : i64, tpu.core_type = #tpu.core_type<tc>, window_params = [{transform_indices = @transform_0, window_bounds = array<i64: 16, 128>}, {pipeline_mode = #tpu.pipeline_mode<synchronous>, transform_indices = @transform_1, window_bounds = array<i64: 128, 128>}, {pipeline_mode = #tpu.pipeline_mode<synchronous>, transform_indices = @transform_2, window_bounds = array<i64: 1, 128>}, {transform_indices = @transform_3, window_bounds = array<i64: 16, 128>}]} {
    %c0 = arith.constant 0 : index
    %c0_0 = arith.constant 0 : index
    %0 = vector.load %arg1[%c0, %c0_0] : memref<16x128xf32, #tpu.memory_space<vmem>>, vector<16x128xf32>
    %cst = arith.constant dense<0.000000e+00> : vector<16xf32>
    %1 = vector.multi_reduction <add>, %0, %cst [1] : vector<16x128xf32> to vector<16xf32>
    %2 = vector.shape_cast %1 : vector<16xf32> to vector<16x1xf32>
    %cst_1 = arith.constant 1.280000e+02 : f32
    %3 = vector.broadcast %cst_1 : f32 to vector<16x1xf32>
    %4 = arith.divf %2, %3 : vector<16x1xf32>
    %5 = vector.broadcast %4 : vector<16x1xf32> to vector<16x128xf32>
    %6 = arith.subf %0, %5 : vector<16x128xf32>
    %7 = arith.mulf %6, %6 : vector<16x128xf32>
    %cst_2 = arith.constant dense<0.000000e+00> : vector<16xf32>
    %8 = vector.multi_reduction <add>, %7, %cst_2 [1] : vector<16x128xf32> to vector<16xf32>
    %9 = vector.shape_cast %8 : vector<16xf32> to vector<16x1xf32>
    %cst_3 = arith.constant 1.280000e+02 : f32
    %10 = vector.broadcast %cst_3 : f32 to vector<16x1xf32>
    %11 = arith.divf %9, %10 : vector<16x1xf32>
    %cst_4 = arith.constant 9.99999974E-6 : f32
    %12 = vector.broadcast %cst_4 : f32 to vector<16x1xf32>
    %13 = arith.addf %11, %12 : vector<16x1xf32>
    %14 = math.rsqrt %13 : vector<16x1xf32>
    %15 = vector.broadcast %14 : vector<16x1xf32> to vector<16x128xf32>
    %16 = arith.mulf %6, %15 : vector<16x128xf32>
    %17 = arith.truncf %16 : vector<16x128xf32> to vector<16x128xbf16>
    %c0_5 = arith.constant 0 : index
    %c0_6 = arith.constant 0 : index
    %18 = vector.load %arg2[%c0_5, %c0_6] : memref<128x128xbf16, #tpu.memory_space<vmem>>, vector<128x128xbf16>
    %cst_7 = arith.constant dense<0.000000e+00> : vector<16x128xf32>
    %19 = tpu.matmul %17, %18, %cst_7 {dimension_numbers = #tpu.dot_dimension_numbers<[1], [0], [0], [1], [0, 0, 1, 1], [], []>} : vector<16x128xbf16>, vector<128x128xbf16>, vector<16x128xf32> -> vector<16x128xf32>
    %c0_8 = arith.constant 0 : index
    %c0_9 = arith.constant 0 : index
    %20 = vector.load %arg3[%c0_8, %c0_9] : memref<1x128xf32, #tpu.memory_space<vmem>>, vector<1x128xf32>
    %21 = vector.broadcast %20 : vector<1x128xf32> to vector<16x128xf32>
    %22 = arith.addf %19, %21 : vector<16x128xf32>
    %c0_10 = arith.constant 0 : index
    %c0_11 = arith.constant 0 : index
    %23 = vector.load %arg4[%c0_10, %c0_11] : memref<16x128xf32, #tpu.memory_space<vmem>>, vector<16x128xf32>
    tpu.vector_store %arg4[%c0_10, %c0_11], %22 {strides = array<i32>} : memref<16x128xf32, #tpu.memory_space<vmem>>, vector<16x128xf32>,
    return
  }
  func.func @transform_0(%arg0: i32) -> (i32, i32) {
    %c0_i32 = arith.constant 0 : i32
    %c0_i32_0 = arith.constant 0 : i32
    return %arg0, %c0_i32 : i32, i32
  }
  func.func @transform_1(%arg0: i32) -> (i32, i32) {
    %c0_i32 = arith.constant 0 : i32
    %c0_i32_0 = arith.constant 0 : i32
    %c0_i32_1 = arith.constant 0 : i32
    return %c0_i32, %c0_i32_0 : i32, i32
  }
  func.func @transform_2(%arg0: i32) -> (i32, i32) {
    %c0_i32 = arith.constant 0 : i32
    %c0_i32_0 = arith.constant 0 : i32
    %c0_i32_1 = arith.constant 0 : i32
    return %c0_i32, %c0_i32_0 : i32, i32
  }
  func.func @transform_3(%arg0: i32) -> (i32, i32) {
    %c0_i32 = arith.constant 0 : i32
    %c0_i32_0 = arith.constant 0 : i32
    return %arg0, %c0_i32 : i32, i32
  }
}

</mosaic_0001>

<bundles_post_ra>
// kernel: prenorm.1
= control target key start
LH: loop header
LB: loop body
LE: loop exit
PB: predicated region body
PF: predicated region fallthrough
CT: control target
= control target key end

     0   :  { %s829_s12 = smov 0   ;;  %s831_s13 = smov 0   ;;  %s939_s0 = inlined_call_operand.vmem [shape: f32[18,128], index: 0, kind: input, shape index: {}]   ;;  %s940_s1 = inlined_call_operand.vmem [shape: bf16[128,128], index: 1, kind: input, shape index: {}]   ;;  %s941_s2 = inlined_call_operand.vmem [shape: f32[1,128], index: 2, kind: input, shape index: {}]   ;;  %s942_s3 = inlined_call_operand.vmem [shape: f32[18,128], index: 3, kind: output, shape index: {}]  }
   0x1   :  { %s833_s14 = smov 0  }
   0x2 LB: > { %s842_s15 = sadd.s32 4294967295, %s773_s14   ;;  %s844_s16 = sadd.s32 1, %s773_s14   ;;  %s773_s14 = sphi %s833_s14, %s946_s14   ;;  %s769_s13 = sphi %s831_s13, %s945_s13   ;;  %s765_s12 = sphi %s829_s12, %s944_s12  }
   0x3   : > { %s85_s17 = ssub.s32 %s773_s14, %s844_s16  ;;  %s88_s18 = sadd.s32 1, %s769_s13 }
   0x4   : > { %p86_p0 = scmp.eq.s32.totalorder %s85_s17, 0  ;;  %p98_p1 = scmp.ne.s32.totalorder %s769_s13, %s765_s12 }
   0x5   : > { %p99_p2 = scmp.eq.s32.totalorder %s842_s15, 1  ;;  %p555_p3 = scmp.ge.s32.totalorder %s773_s14, 1 }
   0x6   : > { %s852_s19 = scalar_select %p86_p0, %s769_s13, %s88_s18  }
   0x7   : > { %p854_p4 = por %p99_p2, %p98_p1  ;;  %p146_p5 = scmp.lt.s32.totalorder %s773_s14, 3 }
   0x9   : > { %p147_p6 = pnand %p555_p3, %p146_p5 }
   0xa   : > { %s859_s21 = sshll.u32 (!%p147_p6), %s842_s15, 1  ;;  %v707_v2 = vld [vmem:[%s940_s1] sm:$0xff] (!%p147_p6)   ;;  %v807_v3 = vmov (!%p147_p6), 0.0   ;;  %v708_v4 = vld [vmem:[%s940_s1 + $0x8] sm:$0xff] (!%p147_p6)   ;;  %v709_v13 = vld [vmem:[%s940_s1 + $0x10] sm:$0xff] (!%p147_p6)   ;;  %vm808_vm0 = vmmov (!%p147_p6), 0  }
   0xb   : > { %150 = sbr.rel (%p147_p6) target bundleno = 602 (0x25a), region = 32  ;;  %p178_p7 = scmp.lt.s32.totalorder (!%p147_p6), %s859_s21, 2  ;;  %597 = vmatprep.subr.bf16.mxu0 (!%p147_p6), %v807_v3  ;;  %v710_v14 = vld [vmem:[%s940_s1 + $0x18] sm:$0xff] (!%p147_p6)   ;;  %v711_v15 = vld [vmem:[%s940_s1 + $0x20] sm:$0xff] (!%p147_p6)   ;;  %v712_v16 = vld [vmem:[%s940_s1 + $0x28] sm:$0xff] (!%p147_p6)   ;;  %613 = vmatprep.mubr.msk.bf16.mxu0 (!%p147_p6), %vm808_vm0, %v807_v3 }
   0xc   : > { %598 = vmatpush3.bf16.msra.mxu0 (!%p147_p6), %v707_v2  ;;  %v713_v17 = vld [vmem:[%s940_s1 + $0x30] sm:$0xff] (!%p147_p6)   ;;  %v714_v18 = vld [vmem:[%s940_s1 + $0x38] sm:$0xff] (!%p147_p6)   ;;  %v559_v30 = vld [vmem:[%s941_s2] ss:$0 sm:$0xff] (!%p147_p6) }
   0xd   : > { %599 = vmatprep.subr.bf16.mxu0 (!%p147_p6), %v807_v3 }
  0x10   : > { %600 = vmatpush3.bf16.msra.mxu0 (!%p147_p6), %v708_v4 }
  0x11   : > { %601 = vmatprep.subr.bf16.mxu0 (!%p147_p6), %v807_v3 }
  0x12   : > { %s179_s22 = scalar_select %p178_p7, %s859_s21, 2 }
  0x13   : > { %s585_s28 = sshll.u32 (%p854_p4), %s842_s15, 4 }
  0x14   : > { %s558_s23 = sshll.u32 %s179_s22, 3  ;;  %602 = vmatpush3.bf16.msra.mxu0 %v709_v13  ;;  %s905_s4 = scalar_lea.vmem (%p854_p4), %s942_s3, %s585_s28  }
  0x15   : > { %s181_s26 = scalar_lea.vmem %s939_s0, %s558_s23  ;;  %603 = vmatprep.subr.bf16.mxu0 %v807_v3  ;;  %s170_s23 = sand.u32 1, %s765_s12  }
  0x16   : > { %v193_v0 = vld [vmem:[%s181_s26] sm:$0xff]  ;;  %v194_v1 = vld [vmem:[%s181_s26 + $0x8] sm:$0xff]  ;;  %s556_s24 = sshll.u32 %s170_s23, 4  ;;  %s341_s12 = ssub.s32 (%p854_p4), 3, %s859_s21 }
  0x17   : > { %195 = vadd.xlane.f32.xlu0 %v193_v0  ;;  %s894_s27 = scalar_lea.vmem [#allocation2], %s556_s24   ;;  %p342_p8 = scmp.lt.s32.totalorder (%p854_p4), %s341_s12, 2 }
  0x18   : > { %604 = vmatpush3.bf16.msra.mxu0 %v710_v14 }
  0x19   : > { %605 = vmatprep.subr.bf16.mxu0 %v807_v3 }
  0x1b   : > { %197 = vadd.xlane.f32.xlu0 %v194_v1 }
  0x1c   : > { %606 = vmatpush3.bf16.msra.mxu0 %v711_v15 }
  0x1d   : > { %607 = vmatprep.subr.bf16.mxu0 %v807_v3 }
  0x20   : > { %608 = vmatpush3.bf16.msra.mxu0 %v712_v16 }
  0x21   : > { %609 = vmatprep.subr.bf16.mxu0 %v807_v3 }
  0x24   : > { %610 = vmatpush3.bf16.msra.mxu0 %v713_v17 }
  0x25   : > { %611 = vmatprep.subr.bf16.mxu0 %v807_v3 }
  0x28   : > { %612 = vmatpush3.bf16.msra.mxu0 %v714_v18 }
  0xa4   : > { %v196_v5 = vpop.xlane.xlu0 %195 }
  0xa5   : > { %v200_v6 = vmul.f32 0.0078125, %v196_v5 }
  0xa7   : > { %v202_v7 = vsub.f32 %v193_v0, %v200_v6 }
  0xa8   : > { %v198_v8 = vpop.xlane.xlu0 %197 }
  0xa9   : > { %v201_v9 = vmul.f32 0.0078125, %v198_v8  ;;  %v204_v10 = vmul.f32 %v202_v7, %v202_v7 }
  0xab   : > { %v203_v11 = vsub.f32 %v194_v1, %v201_v9  ;;  %206 = vadd.xlane.f32.xlu1 %v204_v10 }
  0xad   : > { %v205_v12 = vmul.f32 %v203_v11, %v203_v11 }
  0xaf   : > { %208 = vadd.xlane.f32.xlu1 %v205_v12 }
 0x138   : > { %v207_v19 = vpop.xlane.xlu1 %206 }
 0x139   : > { %v210_v20 = vmul.f32 0.0078125, %v207_v19 }
 0x13b   : > { %v212_v21 = vadd.f32 1e-05, %v210_v20 }
 0x13c   : > { %v209_v22 = vpop.xlane.xlu1 %208 }
 0x13d   : > { %v211_v23 = vmul.f32 0.0078125, %v209_v22  ;;  %715 = vrsqrt.f32 %v212_v21 }
 0x13f   : > { %v213_v24 = vadd.f32 1e-05, %v211_v23 }
 0x141   : > { %717 = vrsqrt.f32 %v213_v24 }
 0x147   : > { %v716_v25 = vpop.eup %715 }
 0x148   : > { %v216_v27 = vmul.f32 %v716_v25, %v202_v7 }
 0x14b   : > { %v718_v26 = vpop.eup %717 }
 0x14c   : > { %v217_v28 = vmul.f32 %v718_v26, %v203_v11 }
 0x14e   : > { %v218_v29 = vpack.c.bf16 %v217_v28, %v216_v27 }
 0x150   : > { %614 = vmatmul.mubr.bf16.vlgmr.msra.gmra.mrb[0].mxu0 %v218_v29 }
 0x222   : > { %339 = sbr.rel (!%p854_p4) target bundleno = 602 (0x25a), region = 36 }
 0x223   : > { %v324_v31 = vpop.f32.mrb[0].mxu0 }
 0x224   : > { %v325_v32 = vadd.f32 %v559_v30, %v324_v31  ;;  %v615_v33 = vpop.f32.mrb[1].mxu0 }
 0x225   : > { %v327_v34 = vpop.f32.mrb[2].mxu0 }
 0x226   : > { %331 = vst [vmem:[%s894_s27] sm:$0xff] %v325_v32  ;;  %v328_v35 = vadd.f32 %v559_v30, %v327_v34  ;;  %v616_v36 = vpop.f32.mrb[3].mxu0 }
 0x228   : > { %332 = vst [vmem:[%s894_s27 + $0x8] sm:$0xff] %v328_v35 }
 0x229   : > { %s948_s12 = smov (!%p342_p8, %s341_s12), 2 }
 0x22a   : > { %s570_s5 = sshll.u32 %s948_s12, 7 }
 0x22b   : > { %p573_p9 = scmp.eq.s32.totalorder %s570_s5, 0 }
 0x22c   : > { %s911_s6 = sshrl.u32 (!%p573_p9), %s948_s12, 1 }
 0x22d   : > { %350 = sbr.rel (%p573_p9) target bundleno = 602 (0x25a), region = 40  ;;  %p574_p10 = scmp.le.s32.totalorder (!%p573_p9), %s911_s6, 0 }
 0x234   : > { %508 = sbr.rel (%p574_p10) target bundleno = 581 (0x245), region = 116  ;;  %s775_s15 = smov (!%p574_p10), %s905_s4  }
 0x235   : > { %s779_s20 = smov (!%p574_p10), %s894_s27   ;;  %s783_s21 = smov (!%p574_p10), 0  }
 0x236   : > { %s787_s7 = smov (!%p574_p10), 0  }
 0x23b LB: >> { %v414_v37 = vld [vmem:[%s781_s20] sm:$0xff]  ;;  %v416_v38 = vld [vmem:[%s781_s20 + $0x8] sm:$0xff]  ;;  %s418_s8 = sadd.s32 1, %s785_s21  ;;  %s408_s7 = sadd.s32 1, %s789_s7   ;;  %s789_s7 = sphi %s787_s7, %s408_s7   ;;  %s785_s21 = sphi %s783_s21, %s784_s21   ;;  %s781_s20 = sphi %s779_s20, %s423_s20   ;;  %s777_s15 = sphi %s775_s15, %s424_s15  }
 0x23c   : >> { %415 = vst [vmem:[%s777_s15] sm:$0xff] %v414_v37  ;;  %417 = vst [vmem:[%s777_s15 + $0x8] sm:$0xff] %v416_v38  ;;  %p419_p11 = scmp.ge.s32.totalorder %s418_s8, %s911_s6  ;;  %p407_p12 = scmp.ge.s32.totalorder %s408_s7, %s911_s6 }
 0x23e   : >> { %s950_s8 = smov (%p419_p11, %s418_s8), 0  ;;  %410 = sbr.rel (!%p407_p12) target bundleno = 571 (0x23b), region = 122 }
 0x23f   : >> { %s575_s9 = sshll.u32 %s950_s8, 4  ;;  %s784_s21 = smov %s950_s8  }
 0x240   : >> { %s423_s20 = scalar_lea.vmem %s894_s27, %s575_s9 [#allocation2]   ;;  %s424_s15 = scalar_lea.vmem %s905_s4, %s575_s9  }
 0x245 PF: > { %s921_s10 = sand.u32 1, %s948_s12   ;;  %s586_s11 = sshll.u32 %s911_s6, 4 }
 0x246   : > { %s429_s14 = scalar_lea.vmem %s894_s27, %s586_s11 [#allocation2]   ;;  %s431_s17 = scalar_lea.vmem %s905_s4, %s586_s11  }
 0x247   : > { %p580_p13 = scmp.le.s32.totalorder %s921_s10, 0 }
 0x248   : > { %s791_s18 = smov (!%p580_p13), %s431_s17   ;;  %s795_s22 = smov (!%p580_p13), %s429_s14  }
 0x249   : > { %522 = sbr.rel (%p580_p13) target bundleno = 602 (0x25a), region = 127  ;;  %s799_s23 = smov (!%p580_p13), 0  }
 0x24a   : > { %s803_s24 = smov (!%p580_p13), 0  }
 0x250 LB: >> { %v441_v39 = vld [vmem:[%s797_s22] sm:$0xff]  ;;  %s443_s25 = sadd.s32 1, %s801_s23  ;;  %s435_s24 = sadd.s32 1, %s805_s24   ;;  %s805_s24 = sphi %s803_s24, %s435_s24   ;;  %s801_s23 = sphi %s799_s23, %s800_s23   ;;  %s797_s22 = sphi %s795_s22, %s448_s22   ;;  %s793_s18 = sphi %s791_s18, %s449_s18  }
 0x251   : >> { %442 = vst [vmem:[%s793_s18] sm:$0xff] %v441_v39  ;;  %p444_p0 = scmp.ge.s32.totalorder %s443_s25, %s921_s10  ;;  %p434_p1 = scmp.ge.s32.totalorder %s435_s24, %s921_s10 }
 0x253   : >> { %s952_s25 = smov (%p444_p0, %s443_s25), 0  ;;  %437 = sbr.rel (!%p434_p1) target bundleno = 592 (0x250), region = 133 }
 0x254   : >> { %s581_s26 = sshll.u32 %s952_s25, 3  ;;  %s800_s23 = smov %s952_s25  }
 0x255   : >> { %s448_s22 = scalar_lea.vmem %s429_s14, %s581_s26 [#allocation2]   ;;  %s449_s18 = scalar_lea.vmem %s431_s17, %s581_s26  }
 0x25a PF: > { %p10_p2 = scmp.ge.s32.totalorder %s844_s16, 4   ;;  %s944_s12 = smov %s769_s13 }
 0x25b   : > { %s945_s13 = smov %s852_s19  ;;  %s946_s14 = smov %s844_s16 }
 0x25c   :  { %12 = sbr.rel (!%p10_p2) target bundleno = 2 (0x2), region = 144 }

</bundles_post_ra>
